<compile_context>
chip_gen: v7x
topology: tpu7x:2x2x1
jax: 0.10.0
libtpu: 0.0.40
codegen_flags: <defaults>
</compile_context>

<pallas_src>
import functools

import jax
import jax.numpy as jnp
import numpy as np
from jax.experimental import pallas as pl
from jax.experimental.pallas import tpu as pltpu

LEAKINESS = 0.01
EPS = 1e-5          # PyTorch InstanceNorm2d default eps
K = 3               # kernel_size
STRIDE = 2
PAD = (K - 1) // 2  # = 1
LANE = 128


def _downsample_kernel(cols_ref, w_ref, g_ref, b_ref, o_ref, *, bn, s):
    # cols_ref : (bn, S, KKC)  bf16   im2col patches for bn samples
    # w_ref    : (KKC, TC)     bf16   conv weights (kh,kw,cin) x cout-tile
    # g_ref    : (1, TC)       f32    instance-norm gamma (channel tile)
    # b_ref    : (1, TC)       f32    instance-norm beta  (channel tile)
    # o_ref    : (bn, S, TC)
    w = w_ref[...]
    gamma = g_ref[...]
    beta = b_ref[...]
    inv_s = 1.0 / float(s)

    # Single batched GEMM on the MXU: merge (bn, S) -> bn*S rows (layout-free,
    # S is kept a multiple of 8 whenever bn > 1). bf16 operands, f32 accum.
    # Conv bias omitted: it is cancelled exactly by the mean subtraction below.
    x2 = cols_ref[...].reshape(bn * s, -1)                               # (bn*S, KKC)
    acc = jnp.dot(x2, w, preferred_element_type=jnp.float32)             # (bn*S, TC)
    acc = acc.reshape(bn, s, -1)                                         # (bn, S, TC)

    # InstanceNorm2d, per-sample stats, two-pass (shifted) variance.
    mean = jnp.sum(acc, axis=1, keepdims=True) * inv_s                   # (bn, 1, TC)
    centered = acc - mean
    var = jnp.sum(centered * centered, axis=1, keepdims=True) * inv_s    # biased
    scale = gamma * jax.lax.rsqrt(var + EPS)                             # (bn, 1, TC)
    y = centered * scale + beta

    # LeakyReLU: for 0 < slope < 1, leaky_relu(y) == max(y, slope*y).
    o_ref[...] = jnp.maximum(y, LEAKINESS * y).astype(o_ref.dtype)


def _tpu_vmem_capacity_bytes():
    try:
        return int(pltpu.get_tpu_info().vmem_capacity_bytes)
    except Exception:
        return 64 << 20  # conservative (v7x per-TensorCore VMEM)


def _mxu_is_256_wide():
    """v6e / v7x have a 256-wide MXU; v2..v5 generations are 128-wide."""
    try:
        kind = jax.devices()[0].device_kind.lower()
    except Exception:
        return True
    return not any(t in kind for t in ("v2", "v3", "v4", "v5"))


def downsampling_module(x_nchw, w_oihw, bias, gamma, beta, out_dtype=jnp.float32):
    """x_nchw: (N, Cin, H, W) float32 -> (N, Cout, Ho, Wo) float32.

    `bias` is accepted for API parity with the PyTorch module but is unused:
    a per-channel constant added before InstanceNorm (per-sample stats) has no
    effect on the output — it is removed by the mean subtraction.
    NOTE: this matches PyTorch's training-mode InstanceNorm2d forward; an
    eval-mode path that *uses* running stats (track_running_stats=True) would
    need the bias and the running buffers.
    On bandwidth-starved parts (v5e) `out_dtype=jnp.bfloat16` halves the output
    writeback; default stays f32 for bit-tight comparisons.
    """
    del bias
    N, Cin, H, W = x_nchw.shape
    Cout = w_oihw.shape[0]
    Ho = (H + 2 * PAD - K) // STRIDE + 1
    Wo = (W + 2 * PAD - K) // STRIDE + 1
    S = Ho * Wo
    KKC = K * K * Cin

    # ---- channel tiling: avoid padding/write-amplification for narrow layers ----
    tc_max = 256 if _mxu_is_256_wide() else 128
    if Cout <= 2 * LANE:
        TC, Cp = Cout, Cout            # full-extent last dim, no padded writeback
    else:
        TC = tc_max
        Cp = ((Cout + TC - 1) // TC) * TC
    ctiles = Cp // TC

    # ---- glue (plain JAX): NCHW -> NHWC bf16, pad, im2col ----
    # With allow_input_fusion below, XLA may fuse this pure data-movement chain
    # into the Pallas input pipeline so `cols` is never round-tripped to HBM.
    # TODO(synk): for very large planes, build the 9 taps fully in-kernel
    # (memory_space=pl.ANY + manual DMA) and add spatial (S) tiling with
    # scratch partial stats; currently the whole spatial plane must fit VMEM.
    x = jnp.transpose(x_nchw, (0, 2, 3, 1)).astype(jnp.bfloat16)          # NHWC bf16
    xpad = jnp.pad(x, ((0, 0), (PAD, PAD), (PAD, PAD), (0, 0)))
    taps = []
    for kh in range(K):
        for kw in range(K):
            taps.append(
                xpad[:, kh:kh + STRIDE * Ho:STRIDE, kw:kw + STRIDE * Wo:STRIDE, :])
    cols = jnp.concatenate(taps, axis=-1).reshape(N, S, KKC)              # (N, S, KKC)

    # weights (Cout, Cin, KH, KW) -> (KH, KW, Cin, Cout) -> (KKC, Cout) -> pad -> bf16
    w2 = jnp.transpose(w_oihw, (2, 3, 1, 0)).reshape(KKC, Cout).astype(jnp.float32)
    w2 = jnp.pad(w2, ((0, 0), (0, Cp - Cout))).astype(jnp.bfloat16)
    g2 = jnp.pad(gamma.astype(jnp.float32), (0, Cp - Cout),
                 constant_values=1.0).reshape(1, Cp)
    bt2 = jnp.pad(beta.astype(jnp.float32), (0, Cp - Cout)).reshape(1, Cp)

    # ---- block sizing (samples per grid step) against a per-generation budget ----
    vmem_cap = _tpu_vmem_capacity_bytes()
    ceiling = (vmem_cap * 3) // 4                      # headroom below physical VMEM
    target = (16 << 20) if vmem_cap >= (96 << 20) else (8 << 20)
    target = min(target, ceiling // 3)

    out_b = jnp.dtype(out_dtype).itemsize
    # double-buffered in/out blocks + ~3 f32 temporaries of the acc tile
    per_bn = 2 * (S * KKC * 2) + 2 * (S * TC * out_b) + 3 * (S * TC * 4)
    fixed = 2 * (KKC * TC * 2) + 4 * (TC * 4)
    if per_bn + fixed > ceiling:
        # TODO(synk): spatial (S) tiling with partial-stat scratch for planes
        # that do not fit a single VMEM block (hit first on v7x's 64 MiB).
        raise ValueError("spatial plane too large for one VMEM block; "
                         "S-tiling not implemented")

    bn = 1
    if S % 8 == 0:  # the in-kernel (bn,S)->(bn*S) merge is layout-free only then
        for d in range(1, N + 1):
            if d * per_bn + fixed <= target:
                bn = d
    # keep >= 2 grid steps so both v7x TensorCores get work (harmless elsewhere)
    if ctiles == 1 and N >= 2:
        bn = min(bn, -(-N // 2))
    grid_b = -(-N // bn)
    Npad = grid_b * bn
    if Npad != N:
        cols = jnp.pad(cols, ((0, Npad - N), (0, 0), (0, 0)))  # zero samples, sliced off

    vmem_limit = int(min(max(bn * per_bn + fixed + (4 << 20), 32 << 20), ceiling))

    out = pl.pallas_call(
        functools.partial(_downsample_kernel, bn=bn, s=S),
        out_shape=jax.ShapeDtypeStruct((Npad, S, Cp), out_dtype),
        grid_spec=pltpu.PrefetchScalarGridSpec(
            num_scalar_prefetch=0,
            grid=(grid_b, ctiles),   # batch outer, channel inner: cols block stays put
            in_specs=[
                pl.BlockSpec((bn, S, KKC), lambda b, c: (b, 0, 0)),
                pl.BlockSpec((KKC, TC), lambda b, c: (0, c)),
                pl.BlockSpec((1, TC), lambda b, c: (0, c)),
                pl.BlockSpec((1, TC), lambda b, c: (0, c)),
            ],
            out_specs=pl.BlockSpec((bn, S, TC), lambda b, c: (b, 0, c)),
        ),
        compiler_params=pltpu.CompilerParams(
            dimension_semantics=("parallel", "parallel"),
            allow_input_fusion=[True, False, False, False],
            vmem_limit_bytes=vmem_limit),
    )(cols, w2, g2, bt2)

    # ---- glue: drop batch/channel padding, back to NCHW ----
    out = out[:N, :, :Cout].reshape(N, Ho, Wo, Cout)
    # TODO(synk): keep the surrounding network NHWC end-to-end to avoid this
    # extra HBM round trip back to NCHW.
    return jnp.transpose(out, (0, 3, 1, 2)).astype(jnp.float32)


def _reference_f32(x_nchw, w_oihw, bias, gamma, beta):
    """Pure-JAX f32 reference of the module's forward pass (with conv bias)."""
    y = jax.lax.conv_general_dilated(
        x_nchw, w_oihw, window_strides=(STRIDE, STRIDE),
        padding=((PAD, PAD), (PAD, PAD)),
        dimension_numbers=("NCHW", "OIHW", "NCHW"))
    y = y + bias.reshape(1, -1, 1, 1)
    mean = jnp.mean(y, axis=(2, 3), keepdims=True)
    var = jnp.mean((y - mean) ** 2, axis=(2, 3), keepdims=True)
    y = (y - mean) * jax.lax.rsqrt(var + EPS)
    y = y * gamma.reshape(1, -1, 1, 1) + beta.reshape(1, -1, 1, 1)
    return jnp.where(y >= 0, y, LEAKINESS * y)


def _reference_matched(x_nchw, w_oihw, bias, gamma, beta):
    """Same forward pass, conv operands in bf16 (matching the kernel's GEMM
    precision); accumulation and the norm stay f32."""
    y = jax.lax.conv_general_dilated(
        x_nchw.astype(jnp.bfloat16), w_oihw.astype(jnp.bfloat16),
        window_strides=(STRIDE, STRIDE),
        padding=((PAD, PAD), (PAD, PAD)),
        dimension_numbers=("NCHW", "OIHW", "NCHW"),
        preferred_element_type=jnp.float32)
    y = y + bias.reshape(1, -1, 1, 1)
    mean = jnp.mean(y, axis=(2, 3), keepdims=True)
    var = jnp.mean((y - mean) ** 2, axis=(2, 3), keepdims=True)
    y = (y - mean) * jax.lax.rsqrt(var + EPS)
    y = y * gamma.reshape(1, -1, 1, 1) + beta.reshape(1, -1, 1, 1)
    return jnp.where(y >= 0, y, LEAKINESS * y)


if __name__ == "__main__":
    # Small deterministic example: input_channels=4, output_channels=8 (doubled)
    N, Cin, H, W = 2, 4, 16, 16
    Cout = 2 * Cin

    key = jax.random.PRNGKey(0)
    k1, k2, k3, k4, k5 = jax.random.split(key, 5)
    x = jax.random.normal(k1, (N, Cin, H, W), jnp.float32)

    # Conv2d-style deterministic init (uniform in +/- 1/sqrt(fan_in)).
    fan_in = Cin * K * K
    bound = 1.0 / np.sqrt(fan_in)
    w = jax.random.uniform(k2, (Cout, Cin, K, K), jnp.float32, -bound, bound)
    b = jax.random.uniform(k3, (Cout,), jnp.float32, -bound, bound)
    # Instance-norm affine params (perturbed from default 1/0 to exercise them).
    gamma = 1.0 + 0.1 * jax.random.normal(k4, (Cout,), jnp.float32)
    beta = 0.1 * jax.random.normal(k5, (Cout,), jnp.float32)

    out = downsampling_module(x, w, b, gamma, beta)
    out = jax.block_until_ready(out)
    assert out.shape == (N, Cout, H // 2, W // 2), out.shape

    out_np = np.asarray(out)
    # Tight check vs a reference whose conv uses the same bf16 operand precision
    # (only accumulation-order / bias-cancellation level differences remain).
    ref_bf = np.asarray(_reference_matched(x, w, b, gamma, beta))
    np.testing.assert_allclose(out_np, ref_bf, rtol=3e-3, atol=3e-3)
    # Loose check vs the full-f32 reference (tolerance reflects the bf16 GEMM
    # operands; the instance-norm math itself runs in f32).
    ref32 = np.asarray(_reference_f32(x, w, b, gamma, beta))
    np.testing.assert_allclose(out_np, ref32, rtol=3e-2, atol=3e-2)

    print("KERNEL_OK")
</pallas_src>

<mosaic_0001>
module attributes {stable_mosaic.version = 11 : i64} {
  func.func @_downsample_kernel(%arg0: i32, %arg1: i32, %arg2: memref<1x64x36xbf16, #tpu.memory_space<vmem>>, %arg3: memref<36x8xbf16, #tpu.memory_space<vmem>>, %arg4: memref<1x8xf32, #tpu.memory_space<vmem>>, %arg5: memref<1x8xf32, #tpu.memory_space<vmem>>, %arg6: memref<1x64x8xf32, #tpu.memory_space<vmem>>) attributes {dimension_semantics = [#tpu.dimension_semantics<parallel>, #tpu.dimension_semantics<parallel>], iteration_bounds = array<i64: 2, 1>, scalar_prefetch = 0 : i64, scratch_operands = 0 : i64, tpu.core_type = #tpu.core_type<tc>, window_params = [{transform_indices = @transform_0, window_bounds = array<i64: 1, 64, 36>}, {transform_indices = @transform_1, window_bounds = array<i64: 36, 8>}, {transform_indices = @transform_2, window_bounds = array<i64: 1, 8>}, {transform_indices = @transform_3, window_bounds = array<i64: 1, 8>}, {transform_indices = @transform_4, window_bounds = array<i64: 1, 64, 8>}]} {
    %c0 = arith.constant 0 : index
    %c0_0 = arith.constant 0 : index
    %0 = vector.load %arg3[%c0, %c0_0] : memref<36x8xbf16, #tpu.memory_space<vmem>>, vector<36x8xbf16>
    %c0_1 = arith.constant 0 : index
    %c0_2 = arith.constant 0 : index
    %1 = vector.load %arg4[%c0_1, %c0_2] : memref<1x8xf32, #tpu.memory_space<vmem>>, vector<1x8xf32>
    %c0_3 = arith.constant 0 : index
    %c0_4 = arith.constant 0 : index
    %2 = vector.load %arg5[%c0_3, %c0_4] : memref<1x8xf32, #tpu.memory_space<vmem>>, vector<1x8xf32>
    %c0_5 = arith.constant 0 : index
    %c0_6 = arith.constant 0 : index
    %c0_7 = arith.constant 0 : index
    %3 = vector.load %arg2[%c0_5, %c0_6, %c0_7] : memref<1x64x36xbf16, #tpu.memory_space<vmem>>, vector<1x64x36xbf16>
    %4 = vector.shape_cast %3 : vector<1x64x36xbf16> to vector<64x36xbf16>
    %cst = arith.constant dense<0.000000e+00> : vector<64x8xf32>
    %5 = tpu.matmul %4, %0, %cst {dimension_numbers = #tpu.dot_dimension_numbers<[1], [0], [0], [1], [0, 0, 1, 1], [], []>} : vector<64x36xbf16>, vector<36x8xbf16>, vector<64x8xf32> -> vector<64x8xf32>
    %6 = vector.shape_cast %5 : vector<64x8xf32> to vector<1x64x8xf32>
    %cst_8 = arith.constant dense<0.000000e+00> : vector<1x8xf32>
    %7 = vector.multi_reduction <add>, %6, %cst_8 [1] : vector<1x64x8xf32> to vector<1x8xf32>
    %8 = vector.shape_cast %7 : vector<1x8xf32> to vector<1x1x8xf32>
    %cst_9 = arith.constant 1.562500e-02 : f32
    %9 = vector.broadcast %cst_9 : f32 to vector<1x1x8xf32>
    %10 = arith.mulf %8, %9 : vector<1x1x8xf32>
    %11 = vector.broadcast %10 : vector<1x1x8xf32> to vector<1x64x8xf32>
    %12 = arith.subf %6, %11 : vector<1x64x8xf32>
    %13 = arith.mulf %12, %12 : vector<1x64x8xf32>
    %cst_10 = arith.constant dense<0.000000e+00> : vector<1x8xf32>
    %14 = vector.multi_reduction <add>, %13, %cst_10 [1] : vector<1x64x8xf32> to vector<1x8xf32>
    %15 = vector.shape_cast %14 : vector<1x8xf32> to vector<1x1x8xf32>
    %cst_11 = arith.constant 1.562500e-02 : f32
    %16 = vector.broadcast %cst_11 : f32 to vector<1x1x8xf32>
    %17 = arith.mulf %15, %16 : vector<1x1x8xf32>
    %cst_12 = arith.constant 9.99999974E-6 : f32
    %18 = vector.broadcast %cst_12 : f32 to vector<1x1x8xf32>
    %19 = arith.addf %17, %18 : vector<1x1x8xf32>
    %20 = math.rsqrt %19 : vector<1x1x8xf32>
    %21 = vector.shape_cast %1 : vector<1x8xf32> to vector<1x1x8xf32>
    %22 = arith.mulf %21, %20 : vector<1x1x8xf32>
    %23 = vector.broadcast %22 : vector<1x1x8xf32> to vector<1x64x8xf32>
    %24 = arith.mulf %12, %23 : vector<1x64x8xf32>
    %25 = vector.shape_cast %2 : vector<1x8xf32> to vector<1x1x8xf32>
    %26 = vector.broadcast %25 : vector<1x1x8xf32> to vector<1x64x8xf32>
    %27 = arith.addf %24, %26 : vector<1x64x8xf32>
    %cst_13 = arith.constant 0.00999999977 : f32
    %28 = vector.broadcast %cst_13 : f32 to vector<1x64x8xf32>
    %29 = arith.mulf %28, %27 : vector<1x64x8xf32>
    %30 = arith.maximumf %27, %29 : vector<1x64x8xf32>
    %c0_14 = arith.constant 0 : index
    %c0_15 = arith.constant 0 : index
    %c0_16 = arith.constant 0 : index
    %31 = vector.load %arg6[%c0_14, %c0_15, %c0_16] : memref<1x64x8xf32, #tpu.memory_space<vmem>>, vector<1x64x8xf32>
    tpu.vector_store %arg6[%c0_14, %c0_15, %c0_16], %30 {strides = array<i32>} : memref<1x64x8xf32, #tpu.memory_space<vmem>>, vector<1x64x8xf32>,
    return
  }
  func.func @transform_0(%arg0: i32, %arg1: i32) -> (i32, i32, i32) {
    %c0_i32 = arith.constant 0 : i32
    %c0_i32_0 = arith.constant 0 : i32
    %c0_i32_1 = arith.constant 0 : i32
    return %arg0, %c0_i32, %c0_i32_0 : i32, i32, i32
  }
  func.func @transform_1(%arg0: i32, %arg1: i32) -> (i32, i32) {
    %c0_i32 = arith.constant 0 : i32
    %c0_i32_0 = arith.constant 0 : i32
    return %c0_i32, %arg1 : i32, i32
  }
  func.func @transform_2(%arg0: i32, %arg1: i32) -> (i32, i32) {
    %c0_i32 = arith.constant 0 : i32
    %c0_i32_0 = arith.constant 0 : i32
    return %c0_i32, %arg1 : i32, i32
  }
  func.func @transform_3(%arg0: i32, %arg1: i32) -> (i32, i32) {
    %c0_i32 = arith.constant 0 : i32
    %c0_i32_0 = arith.constant 0 : i32
    return %c0_i32, %arg1 : i32, i32
  }
  func.func @transform_4(%arg0: i32, %arg1: i32) -> (i32, i32, i32) {
    %c0_i32 = arith.constant 0 : i32
    %c0_i32_0 = arith.constant 0 : i32
    return %arg0, %c0_i32, %arg1 : i32, i32, i32
  }
}

</mosaic_0001>

<bundles_post_ra>
// kernel: tpu_custom_call.1
= control target key start
LH: loop header
LB: loop body
LE: loop exit
PB: predicated region body
PF: predicated region fallthrough
CT: control target
= control target key end

     0   :  { %s768_s15 = smov 0   ;;  %s770_s16 = smov 0   ;;  %s844_s0 = inlined_call_operand.vmem [shape: bf16[2,64,36], index: 0, kind: input, shape index: {}]   ;;  %s845_s1 = inlined_call_operand.vmem [shape: bf16[36,8], index: 1, kind: input, shape index: {}]   ;;  %s846_s2 = inlined_call_operand.vmem [shape: f32[1,8], index: 2, kind: input, shape index: {}]   ;;  %s847_s3 = inlined_call_operand.vmem [shape: f32[1,8], index: 3, kind: input, shape index: {}]   ;;  %s848_s4 = inlined_call_operand.vmem [shape: f32[2,64,8], index: 4, kind: output, shape index: {}]  }
   0x1   :  { %s772_s17 = smov 0  }
   0x2 LB: > { %s26_s18 = sadd.s32 1, %s737_s16  ;;  %p636_p0 = scmp.ge.s32.totalorder %s741_s17, 1  ;;  %s741_s17 = sphi %s772_s17, %s14_s17   ;;  %s737_s16 = sphi %s770_s16, %s850_s16   ;;  %s733_s15 = sphi %s768_s15, %s849_s15  }
   0x3   : > { %p28_p1 = scmp.ge.s32.totalorder %s26_s18, 2  ;;  %p201_p2 = scmp.lt.s32.totalorder %s741_s17, 3 }
   0x5   : > { %s852_s18 = smov (%p28_p1, %s26_s18), 0  ;;  %p202_p3 = pnand %p636_p0, %p201_p2 }
   0x6   : > { %v710_v0 = vld [vmem:[%s845_s1] sm:$0xff] (!%p202_p3)   ;;  %v711_v1 = vld [vmem:[%s845_s1 + $0x8] sm:$0xff] (!%p202_p3)   ;;  %p240_p4 = scmp.lt.s32.totalorder (!%p202_p3), %s733_s15, 1  ;;  %v712_v2 = vld [vmem:[%s845_s1 + $0x10] ss:$0 sps:$4 sm:$0x33] (!%p202_p3)  }
   0x7   : > { %205 = sbr.rel (%p202_p3) target bundleno = 325 (0x145), region = 36  ;;  %664 = vmatprep.subr.bf16.mxu0 (!%p202_p3), %v710_v0  ;;  %678 = vmatprep.subr.bf16.mxu1 (!%p202_p3), %v710_v0  ;;  %vm327_vm0 = vcmask (!%p202_p3), 1041408   ;;  %vm314_vm1 = vcmask (!%p202_p3), 293888   ;;  %vm396_vm2 = vcmask (!%p202_p3), 64512  }
   0x8   : > { %665 = vmatpush3.bf16.msra.mxu0 (!%p202_p3), %v710_v0  ;;  %681 = vmatpush3.bf16.msra.mxu1 (!%p202_p3), %v710_v0  ;;  %v329_v4 = vsel (!%p202_p3), %vm327_vm0, %v712_v2, 0 }
   0x9   : > { %666 = vmatprep.subr.bf16.mxu0 (!%p202_p3), %v711_v1  ;;  %679 = vmatprep.subr.bf16.mxu1 (!%p202_p3), %v711_v1 }
   0xc   : > { %667 = vmatpush3.bf16.msra.mxu0 (!%p202_p3), %v711_v1  ;;  %682 = vmatpush3.bf16.msra.mxu1 (!%p202_p3), %v711_v1 }
   0xd   : > { %684 = vmatprep.subr.msk.bf16.mxu0 (!%p202_p3), %vm327_vm0, %v712_v2  ;;  %685 = vmatprep.subr.msk.bf16.mxu1 (!%p202_p3), %vm327_vm0, %v712_v2 }
   0xe   : > { %s854_s15 = smov (!%p240_p4, %s733_s15), 1 }
   0xf   : > { %s655_s25 = sshll.u32 %s854_s15, 5  ;;  %s656_s7 = sshll.u32 %s854_s15, 6 }
  0x10   : > { %s244_s28 = scalar_lea.vmem %s844_s0, %s655_s25  ;;  %669 = vmatpush3.bf16.msra.mxu0 %v329_v4  ;;  %683 = vmatpush3.bf16.msra.mxu1 %v329_v4  ;;  %s262_s10 = scalar_lea.vmem %s848_s4, %s656_s7 }
  0x11   : > { %v713_v3 = vld [vmem:[%s244_s28] sm:$0xff]   ;;  %v714_v5 = vld [vmem:[%s244_s28 + $0x8] sm:$0xff]   ;;  %v715_v6 = vld [vmem:[%s244_s28 + $0x10] sm:$0xff]  }
  0x12   : > { %670 = vmatprep.mubr.msk.bf16.mxu0 %vm314_vm1, %v713_v3  ;;  %v716_v7 = vld [vmem:[%s244_s28 + $0x18] sm:$0xff]   ;;  %674 = vmatprep.mubr.msk.bf16.mxu1 %vm314_vm1, %v715_v6 }
  0x13   : > { %671 = vmatmul.mubr.msk.bf16.vlgmr.msra.gmra.mrb[0].mxu0 %vm314_vm1, %v714_v5  ;;  %675 = vmatmul.mubr.msk.bf16.vlgmr.msra.gmra.mrb[0].mxu1 %vm314_vm1, %v716_v7 }
  0xe6   : > { %v672_v8 = vpop.f32.mrb[0].mxu0  ;;  %v676_v9 = vpop.f32.mrb[0].mxu1 }
  0xe7   : > { %v365_v10 = vpop.f32.mrb[1].mxu0  ;;  %v381_v11 = vpop.f32.mrb[1].mxu1  ;;  %v400_v19 = vsel %vm396_vm2, %v672_v8, 0.0  ;;  %v408_v27 = vsel %vm396_vm2, %v676_v9, 0.0 }
  0xe8   : > { %v673_v12 = vpop.f32.mrb[2].mxu0  ;;  %v677_v13 = vpop.f32.mrb[2].mxu1  ;;  %v397_v16 = vsel %vm396_vm2, %v365_v10, 0.0  ;;  %v404_v22 = vsel %vm396_vm2, %v381_v11, 0.0 }
  0xe9   : > { %v368_v14 = vpop.f32.mrb[3].mxu0  ;;  %v384_v15 = vpop.f32.mrb[3].mxu1  ;;  %v402_v21 = vsel %vm396_vm2, %v673_v12, 0.0  ;;  %v410_v29 = vsel %vm396_vm2, %v677_v13, 0.0 }
  0xea   : > { %v398_v17 = vsel %vm396_vm2, %v368_v14, 0.0  ;;  %v406_v25 = vsel %vm396_vm2, %v384_v15, 0.0 }
  0xeb   : > { %v399_v18 = vadd.f32 %v398_v17, %v397_v16 }
  0xed   : > { %v401_v20 = vadd.f32 %v400_v19, %v399_v18 }
  0xef   : > { %v403_v23 = vadd.f32 %v402_v21, %v401_v20  ;;  %v652_v20 = vld [vmem:[%s847_s3] ss:$0 sm:$0xff] }
  0xf1   : > { %v405_v24 = vadd.f32 %v404_v22, %v403_v23 }
  0xf3   : > { %v407_v26 = vadd.f32 %v406_v25, %v405_v24 }
  0xf5   : > { %v409_v28 = vadd.f32 %v408_v27, %v407_v26 }
  0xf7   : > { %v411_v30 = vadd.f32 %v410_v29, %v409_v28 }
  0xf9   : > { %v412_v31 = vrot.slane %v411_v30, 4 }
  0xfb   : > { %v413_v32 = vadd.f32 %v412_v31, %v411_v30 }
  0xfd   : > { %v414_v33 = vrot.slane %v413_v32, 2 }
  0xff   : > { %v415_v34 = vadd.f32 %v414_v33, %v413_v32 }
 0x101   : > { %v416_v35 = vrot.slane %v415_v34, 1 }
 0x103   : > { %v417_v36 = vadd.f32 %v416_v35, %v415_v34 }
 0x105   : > { %v418_v37 = vmul.f32 0.015625, %v417_v36 }
 0x107   : > { %v419_v38 = vsub.f32 %v365_v10, %v418_v37  ;;  %v420_v39 = vsub.f32 %v368_v14, %v418_v37  ;;  %v421_v40 = vsub.f32 %v672_v8, %v418_v37  ;;  %v422_v41 = vsub.f32 %v673_v12, %v418_v37 }
 0x108   : > { %v423_v42 = vsub.f32 %v381_v11, %v418_v37  ;;  %v424_v43 = vsub.f32 %v384_v15, %v418_v37  ;;  %v425_v44 = vsub.f32 %v676_v9, %v418_v37  ;;  %v426_v45 = vsub.f32 %v677_v13, %v418_v37  ;;  %v269_v15 = vld [vmem:[%s846_s2] sm:$0x1] }
 0x109   : > { %v427_v46 = vmul.f32 %v419_v38, %v419_v38  ;;  %v428_v47 = vmul.f32 %v420_v39, %v420_v39  ;;  %v429_v48 = vmul.f32 %v421_v40, %v421_v40  ;;  %v430_v49 = vmul.f32 %v422_v41, %v422_v41 }
 0x10a   : > { %v431_v53 = vmul.f32 %v423_v42, %v423_v42  ;;  %v432_v56 = vmul.f32 %v424_v43, %v424_v43  ;;  %v433_v59 = vmul.f32 %v425_v44, %v425_v44  ;;  %v434_v62 = vmul.f32 %v426_v45, %v426_v45 }
 0x10b   : > { %v435_v50 = vsel %vm396_vm2, %v427_v46, 0.0  ;;  %v436_v51 = vsel %vm396_vm2, %v428_v47, 0.0  ;;  %v438_v54 = vsel %vm396_vm2, %v429_v48, 0.0  ;;  %v440_v57 = vsel %vm396_vm2, %v430_v49, 0.0 }
 0x10c   : > { %v437_v52 = vadd.f32 %v436_v51, %v435_v50  ;;  %v442_v60 = vsel %vm396_vm2, %v431_v53, 0.0  ;;  %v444_v63 = vsel %vm396_vm2, %v432_v56, 0.0  ;;  %v446_v1 = vsel %vm396_vm2, %v433_v59, 0.0 }
 0x10d   : > { %v448_v3 = vsel %vm396_vm2, %v434_v62, 0.0  ;;  %v461_v13 = vlaneseq }
 0x10e   : > { %v439_v55 = vadd.f32 %v438_v54, %v437_v52 }
 0x10f   : > { %v462_v14 = vshrl.u32 %v461_v13, 7 }
 0x110   : > { %v441_v58 = vadd.f32 %v440_v57, %v439_v55 }
 0x111   : > { %v463_v16 = vsub.s32 0, %v462_v14 }
 0x112   : > { %v443_v61 = vadd.f32 %v442_v60, %v441_v58 }
 0x114   : > { %v445_v0 = vadd.f32 %v444_v63, %v443_v61 }
 0x116   : > { %v447_v2 = vadd.f32 %v446_v1, %v445_v0 }
 0x118   : > { %v449_v4 = vadd.f32 %v448_v3, %v447_v2 }
 0x11a   : > { %v450_v5 = vrot.slane %v449_v4, 4 }
 0x11c   : > { %v451_v6 = vadd.f32 %v450_v5, %v449_v4 }
 0x11e   : > { %v452_v7 = vrot.slane %v451_v6, 2 }
 0x120   : > { %v453_v8 = vadd.f32 %v452_v7, %v451_v6 }
 0x122   : > { %v454_v9 = vrot.slane %v453_v8, 1 }
 0x124   : > { %v455_v10 = vadd.f32 %v454_v9, %v453_v8 }
 0x126   : > { %v456_v11 = vmul.f32 0.015625, %v455_v10 }
 0x128   : > { %v457_v12 = vadd.f32 1e-05, %v456_v11 }
 0x12a   : > { %717 = vrsqrt.f32 %v457_v12 }
 0x134   : > { %v718_v17 = vpop.eup %717 }
 0x135   : > { %v459_v18 = vmul.f32 %v718_v17, %v269_v15 }
 0x137   : > { %v464_v19 = vrot.slane %v459_v18, %v463_v16 }
 0x139   : > { %v466_v21 = vmul.f32 %v464_v19, %v419_v38  ;;  %v467_v22 = vmul.f32 %v464_v19, %v420_v39  ;;  %v468_v23 = vmul.f32 %v464_v19, %v421_v40  ;;  %v469_v24 = vmul.f32 %v464_v19, %v422_v41 }
 0x13a   : > { %v470_v25 = vmul.f32 %v464_v19, %v423_v42  ;;  %v471_v26 = vmul.f32 %v464_v19, %v424_v43  ;;  %v472_v27 = vmul.f32 %v464_v19, %v425_v44  ;;  %v473_v28 = vmul.f32 %v464_v19, %v426_v45 }
 0x13b   : > { %v480_v29 = vadd.f32 %v652_v20, %v466_v21  ;;  %v481_v30 = vadd.f32 %v652_v20, %v467_v22  ;;  %v482_v31 = vadd.f32 %v652_v20, %v468_v23  ;;  %v483_v32 = vadd.f32 %v652_v20, %v469_v24 }
 0x13c   : > { %v484_v33 = vadd.f32 %v652_v20, %v470_v25  ;;  %v485_v34 = vadd.f32 %v652_v20, %v471_v26  ;;  %v486_v35 = vadd.f32 %v652_v20, %v472_v27  ;;  %v487_v36 = vadd.f32 %v652_v20, %v473_v28 }
 0x13d   : > { %v488_v37 = vmul.f32 0.01, %v480_v29  ;;  %v489_v46 = vmul.f32 0.01, %v481_v30  ;;  %v490_v47 = vmul.f32 0.01, %v482_v31 }
 0x13e   : > { %v491_v38 = vmul.f32 0.01, %v483_v32  ;;  %v492_v39 = vmul.f32 0.01, %v484_v33  ;;  %v493_v40 = vmul.f32 0.01, %v485_v34 }
 0x13f   : > { %v494_v41 = vmul.f32 0.01, %v486_v35  ;;  %v495_v42 = vmul.f32 0.01, %v487_v36  ;;  %v496_v43 = vmax.f32 %v480_v29, %v488_v37  ;;  %v497_v44 = vmax.f32 %v481_v30, %v489_v46 }
 0x140   : > { %v498_v45 = vmax.f32 %v482_v31, %v490_v47  ;;  %v499_v48 = vmax.f32 %v483_v32, %v491_v38  ;;  %v500_v49 = vmax.f32 %v484_v33, %v492_v39  ;;  %v501_v50 = vmax.f32 %v485_v34, %v493_v40 }
 0x141   : > { %v502_v51 = vmax.f32 %v486_v35, %v494_v41  ;;  %v503_v52 = vmax.f32 %v487_v36, %v495_v42  ;;  %504 = vst.msk [vmem:[%s262_s10] sm:$0xff] %vm396_vm2, %v496_v43  ;;  %505 = vst.msk [vmem:[%s262_s10 + $0x8] sm:$0xff] %vm396_vm2, %v497_v44 }
 0x142   : > { %506 = vst.msk [vmem:[%s262_s10 + $0x10] sm:$0xff] %vm396_vm2, %v498_v45  ;;  %507 = vst.msk [vmem:[%s262_s10 + $0x18] sm:$0xff] %vm396_vm2, %v499_v48 }
 0x143   : > { %508 = vst.msk [vmem:[%s262_s10 + $0x20] sm:$0xff] %vm396_vm2, %v500_v49  ;;  %509 = vst.msk [vmem:[%s262_s10 + $0x28] sm:$0xff] %vm396_vm2, %v501_v50 }
 0x144   : > { %510 = vst.msk [vmem:[%s262_s10 + $0x30] sm:$0xff] %vm396_vm2, %v502_v51  ;;  %511 = vst.msk [vmem:[%s262_s10 + $0x38] sm:$0xff] %vm396_vm2, %v503_v52 }
 0x145 PF: > { %s14_s17 = sadd.s32 1, %s741_s17   ;;  %s849_s15 = smov %s737_s16 }
 0x146   : > { %p11_p5 = scmp.ge.s32.totalorder %s14_s17, 4   ;;  %s850_s16 = smov %s852_s18 }
 0x148   :  { %13 = sbr.rel (!%p11_p5) target bundleno = 2 (0x2), region = 75 }

</bundles_post_ra>
